<compile_context>
chip_gen: v7x
topology: tpu7x:2x2x1
jax: 0.10.0
libtpu: 0.0.40
codegen_flags: <defaults>
</compile_context>

<pallas_src>
import math

import jax
import jax.numpy as jnp
from jax.experimental import pallas as pl
from jax.experimental.pallas import tpu as pltpu


def _fc_kernel(x_ref, w_ref, b_ref, o_ref, acc_ref):
    k = pl.program_id(2)

    @pl.when(k == 0)
    def _():
        acc_ref[...] = jnp.zeros_like(acc_ref)

    # MXU matmul (bf16 or f32 inputs), f32 accumulation.
    acc_ref[...] += jnp.dot(
        x_ref[...], w_ref[...], preferred_element_type=jnp.float32
    )

    @pl.when(k == pl.num_programs(2) - 1)
    def _():
        y = acc_ref[...] + b_ref[...]  # (tm, tn) + (1, tn), f32
        # Softplus with PyTorch's default beta=1, threshold=20: y > 20 -> identity.
        sp = jnp.log1p(jnp.exp(jnp.minimum(y, 20.0)))
        o_ref[...] = jnp.where(y > 20.0, y, sp).astype(o_ref.dtype)


def _round_up(n, m):
    return ((n + m - 1) // m) * m


def _pad_cast_2d(a, shape, dtype):
    """Cast to dtype and zero-pad up to `shape`; no-op copy avoided if aligned."""
    a = a.astype(dtype)
    if a.shape == shape:
        return a
    pads = [(0, s - d) for d, s in zip(a.shape, shape)]
    return jnp.pad(a, pads)


def full_connection(x, w, b, *, tm=256, tn=256, tk=512,
                    compute_dtype=jnp.bfloat16):
    """x: (B, ...) any trailing shape; w: (IN, OUT); b: (OUT,). Returns f32 (B, OUT)."""
    B = x.shape[0]
    K = math.prod(x.shape[1:])
    N = w.shape[1]
    assert w.shape[0] == K, (w.shape, K)

    x_flat = x.reshape(B, K)

    # Adaptive tiles: shrink for small problems, keep (8, 128) alignment.
    tm = min(tm, _round_up(B, 8))
    tn = min(tn, _round_up(N, 128))
    tk = min(tk, _round_up(K, 128))

    Mp = _round_up(B, tm)
    Kp = _round_up(K, tk)
    Np = _round_up(N, tn)

    # Zero padding contributes nothing to the matmul; padded rows/cols are
    # sliced off on return.
    x_p = _pad_cast_2d(x_flat, (Mp, Kp), compute_dtype)
    w_p = _pad_cast_2d(w, (Kp, Np), compute_dtype)
    b_p = _pad_cast_2d(b.reshape(1, N), (1, Np), jnp.float32)

    grid = (Mp // tm, Np // tn, Kp // tk)
    elt = jnp.dtype(compute_dtype).itemsize

    out = pl.pallas_call(
        _fc_kernel,
        out_shape=jax.ShapeDtypeStruct((Mp, Np), jnp.float32),
        grid_spec=pltpu.PrefetchScalarGridSpec(
            num_scalar_prefetch=0,
            grid=grid,
            in_specs=[
                pl.BlockSpec((tm, tk), lambda i, j, k: (i, k)),
                pl.BlockSpec((tk, tn), lambda i, j, k: (k, j)),
                pl.BlockSpec((1, tn), lambda i, j, k: (0, j)),
            ],
            out_specs=pl.BlockSpec((tm, tn), lambda i, j, k: (i, j)),
            scratch_shapes=[pltpu.VMEM((tm, tn), jnp.float32)],
        ),
        compiler_params=pltpu.CompilerParams(
            dimension_semantics=("parallel", "parallel", "arbitrary"),
        ),
        cost_estimate=pl.CostEstimate(
            flops=2 * Mp * Np * Kp,
            transcendentals=2 * Mp * Np,  # exp + log1p per output element
            bytes_accessed=(Mp * Kp + Kp * Np) * elt + Mp * Np * 4 + Np * 4,
        ),
    )(x_p, w_p, b_p)

    return out[:B, :N]


def _softplus_ref(y):
    return jnp.where(y > 20.0, y, jnp.log1p(jnp.exp(jnp.minimum(y, 20.0))))


if __name__ == "__main__":
    # Module config (defaults): activation=Softplus, use_batch_norm=False, bias=True
    B, C, L = 2, 4, 16               # input (2, 4, 16) -> flattened IN = 64
    in_features = C * L              # 64
    out_features = 32

    key = jax.random.PRNGKey(0)
    kx, kw, kb = jax.random.split(key, 3)

    x = jax.random.normal(kx, (B, C, L), dtype=jnp.float32)

    # Deterministic Linear init (PyTorch-style uniform(-1/sqrt(in), 1/sqrt(in)))
    bound = 1.0 / jnp.sqrt(jnp.float32(in_features))
    w = jax.random.uniform(kw, (in_features, out_features), jnp.float32,
                           minval=-bound, maxval=bound)
    b = jax.random.uniform(kb, (out_features,), jnp.float32,
                           minval=-bound, maxval=bound)

    # Pure-JAX f32 reference: flatten -> Linear -> Softplus.
    y_lin = x.reshape(B, in_features) @ w + b
    ref = _softplus_ref(y_lin)

    # f32 compute path: tight tolerance.
    out_f32 = full_connection(x, w, b, compute_dtype=jnp.float32)
    jax.block_until_ready(out_f32)
    assert out_f32.shape == (B, out_features)
    assert jnp.allclose(out_f32, ref, atol=1e-5, rtol=1e-5)

    # bf16 MXU path (default): looser tolerance for input rounding.
    out_bf16 = full_connection(x, w, b)  # compute_dtype=jnp.bfloat16
    jax.block_until_ready(out_bf16)
    assert out_bf16.shape == (B, out_features)
    assert jnp.allclose(out_bf16, ref, atol=3e-2, rtol=3e-2)

    print("KERNEL_OK")
</pallas_src>

<mosaic_0001>
module attributes {stable_mosaic.version = 11 : i64} {
  func.func @_fc_kernel(%arg0: i32, %arg1: i32, %arg2: i32, %arg3: memref<8x128xf32, #tpu.memory_space<vmem>>, %arg4: memref<128x128xf32, #tpu.memory_space<vmem>>, %arg5: memref<1x128xf32, #tpu.memory_space<vmem>>, %arg6: memref<8x128xf32, #tpu.memory_space<vmem>>, %arg7: memref<8x128xf32, #tpu.memory_space<vmem>>) attributes {dimension_semantics = [#tpu.dimension_semantics<parallel>, #tpu.dimension_semantics<parallel>, #tpu.dimension_semantics<arbitrary>], iteration_bounds = array<i64: 1, 1, 1>, scalar_prefetch = 0 : i64, scratch_operands = 1 : i64, tpu.core_type = #tpu.core_type<tc>, window_params = [{transform_indices = @transform_0, window_bounds = array<i64: 8, 128>}, {transform_indices = @transform_1, window_bounds = array<i64: 128, 128>}, {transform_indices = @transform_2, window_bounds = array<i64: 1, 128>}, {transform_indices = @transform_3, window_bounds = array<i64: 8, 128>}]} {
    %c0_i32 = arith.constant 0 : i32
    %0 = arith.cmpi eq, %arg2, %c0_i32 : i32
    %1 = arith.extui %0 : i1 to i32
    %c0_i32_0 = arith.constant 0 : i32
    %2 = arith.cmpi ne, %1, %c0_i32_0 : i32
    scf.if %2 {
      %cst_10 = arith.constant 0.000000e+00 : f32
      %12 = vector.broadcast %cst_10 : f32 to vector<8x128xf32>
      %c0_11 = arith.constant 0 : index
      %c0_12 = arith.constant 0 : index
      %13 = vector.load %arg7[%c0_11, %c0_12] : memref<8x128xf32, #tpu.memory_space<vmem>>, vector<8x128xf32>
      tpu.vector_store %arg7[%c0_11, %c0_12], %12 {strides = array<i32>} : memref<8x128xf32, #tpu.memory_space<vmem>>, vector<8x128xf32>,
    } else {
    }
    %c0 = arith.constant 0 : index
    %c0_1 = arith.constant 0 : index
    %3 = vector.load %arg7[%c0, %c0_1] : memref<8x128xf32, #tpu.memory_space<vmem>>, vector<8x128xf32>
    %c0_2 = arith.constant 0 : index
    %c0_3 = arith.constant 0 : index
    %4 = vector.load %arg3[%c0_2, %c0_3] : memref<8x128xf32, #tpu.memory_space<vmem>>, vector<8x128xf32>
    %c0_4 = arith.constant 0 : index
    %c0_5 = arith.constant 0 : index
    %5 = vector.load %arg4[%c0_4, %c0_5] : memref<128x128xf32, #tpu.memory_space<vmem>>, vector<128x128xf32>
    %cst = arith.constant dense<0.000000e+00> : vector<8x128xf32>
    %6 = tpu.matmul %4, %5, %cst {dimension_numbers = #tpu.dot_dimension_numbers<[1], [0], [0], [1], [0, 0, 1, 1], [], []>} : vector<8x128xf32>, vector<128x128xf32>, vector<8x128xf32> -> vector<8x128xf32>
    %7 = arith.addf %3, %6 : vector<8x128xf32>
    %c0_6 = arith.constant 0 : index
    %c0_7 = arith.constant 0 : index
    %8 = vector.load %arg7[%c0_6, %c0_7] : memref<8x128xf32, #tpu.memory_space<vmem>>, vector<8x128xf32>
    tpu.vector_store %arg7[%c0_6, %c0_7], %7 {strides = array<i32>} : memref<8x128xf32, #tpu.memory_space<vmem>>, vector<8x128xf32>,
    %c0_i32_8 = arith.constant 0 : i32
    %9 = arith.cmpi eq, %arg2, %c0_i32_8 : i32
    %10 = arith.extui %9 : i1 to i32
    %c0_i32_9 = arith.constant 0 : i32
    %11 = arith.cmpi ne, %10, %c0_i32_9 : i32
    scf.if %11 {
      %c0_10 = arith.constant 0 : index
      %c0_11 = arith.constant 0 : index
      %12 = vector.load %arg7[%c0_10, %c0_11] : memref<8x128xf32, #tpu.memory_space<vmem>>, vector<8x128xf32>
      %c0_12 = arith.constant 0 : index
      %c0_13 = arith.constant 0 : index
      %13 = vector.load %arg5[%c0_12, %c0_13] : memref<1x128xf32, #tpu.memory_space<vmem>>, vector<1x128xf32>
      %14 = vector.broadcast %13 : vector<1x128xf32> to vector<8x128xf32>
      %15 = arith.addf %12, %14 : vector<8x128xf32>
      %cst_14 = arith.constant 2.000000e+01 : f32
      %16 = vector.broadcast %cst_14 : f32 to vector<8x128xf32>
      %17 = arith.minimumf %15, %16 : vector<8x128xf32>
      %18 = math.exp %17 : vector<8x128xf32>
      %19 = math.log1p %18 : vector<8x128xf32>
      %cst_15 = arith.constant 2.000000e+01 : f32
      %20 = vector.broadcast %cst_15 : f32 to vector<8x128xf32>
      %21 = arith.cmpf ogt, %15, %20 : vector<8x128xf32>
      %22 = arith.select %21, %15, %19 : vector<8x128xi1>, vector<8x128xf32>
      %c0_16 = arith.constant 0 : index
      %c0_17 = arith.constant 0 : index
      %23 = vector.load %arg6[%c0_16, %c0_17] : memref<8x128xf32, #tpu.memory_space<vmem>>, vector<8x128xf32>
      tpu.vector_store %arg6[%c0_16, %c0_17], %22 {strides = array<i32>} : memref<8x128xf32, #tpu.memory_space<vmem>>, vector<8x128xf32>,
    } else {
    }
    return
  }
  func.func @transform_0(%arg0: i32, %arg1: i32, %arg2: i32) -> (i32, i32) {
    %c0_i32 = arith.constant 0 : i32
    return %arg0, %arg2 : i32, i32
  }
  func.func @transform_1(%arg0: i32, %arg1: i32, %arg2: i32) -> (i32, i32) {
    %c0_i32 = arith.constant 0 : i32
    return %arg2, %arg1 : i32, i32
  }
  func.func @transform_2(%arg0: i32, %arg1: i32, %arg2: i32) -> (i32, i32) {
    %c0_i32 = arith.constant 0 : i32
    %c0_i32_0 = arith.constant 0 : i32
    return %c0_i32, %arg1 : i32, i32
  }
  func.func @transform_3(%arg0: i32, %arg1: i32, %arg2: i32) -> (i32, i32) {
    %c0_i32 = arith.constant 0 : i32
    return %arg0, %arg1 : i32, i32
  }
}

</mosaic_0001>

<bundles_post_ra>
// kernel: tpu_custom_call.1
= control target key start
LH: loop header
LB: loop body
LE: loop exit
PB: predicated region body
PF: predicated region fallthrough
CT: control target
= control target key end

     0   :  { %8 = vsyncpa [#allocation4], 0  ;;  %s414_s0 = inlined_call_operand.hbm [shape: f32[8,128], index: 0, kind: input, shape index: {}]   ;;  %s415_s1 = inlined_call_operand.hbm [shape: f32[128,128], index: 1, kind: input, shape index: {}]   ;;  %s416_s2 = inlined_call_operand.vmem [shape: f32[1,128], index: 2, kind: input, shape index: {}]   ;;  %s417_s3 = inlined_call_operand.hbm [shape: f32[8,128], index: 3, kind: output, shape index: {}]  }
   0x1   :  { %9 = vsyncpa [#allocation7], 0 }
   0x2   :  { %10 = vsyncpa [#allocation5], 0  ;;  %s340_s12 = smov [#allocation3]   ;;  %s341_s14 = smov [#allocation6]  }
   0x3   :  { %s17_s13 = sshll.u32 %s340_s12, 4  ;;  %s26_s15 = sshll.u32 %s341_s14, 4  ;;  %s18_s13 = int_to_ptr.vmem [resolvable:$true] %s17_s13  ;;  %s368_s15 = int_to_ptr.vmem [resolvable:$true] %s26_s15 }
   0x4   :  { %s268_s18 = scalar_lea.hbm %s414_s0, 128 }
   0x5   :  { %p269_p0 = scmp.ne.s32.totalorder %s414_s0, %s268_s18  ;;  %p272_p1 = scmp.lt.u32.totalorder %s268_s18, %s414_s0 }
   0x7   :  { %p274_p2 = pnand %p272_p1, %p269_p0 }
   0x9   :  { %277 = shalt.err (!%p274_p2)
}
   0xa   :  { %s278_s23 = scalar_lea.vmem %s18_s13, 128  ;;  %p283_p4 = scmp.lt.s32.totalorder %s18_s13, %s18_s13 }
   0xb   :  { %p279_p3 = scmp.ne.s32.totalorder %s18_s13, %s278_s23  ;;  %p284_p5 = scmp.lt.s32.totalorder %s278_s23, %s278_s23 }
   0xd   :  { %p285_p6 = por %p284_p5, %p283_p4 }
   0xf   :  { %p286_p7 = pnand %p285_p6, %p279_p3 }
  0x11   :  { %289 = shalt.err (!%p286_p7)
}
  0x12   :  { %20 = dma.hbm_to_vmem [thread:$0]  %s414_s0, 128, %s18_s13, [#allocation4]  }
  0x13   :  { %s290_s28 = scalar_lea.hbm %s415_s1, 2048 }
  0x14   :  { %p291_p8 = scmp.ne.s32.totalorder %s415_s1, %s290_s28  ;;  %p294_p9 = scmp.lt.u32.totalorder %s290_s28, %s415_s1 }
  0x16   :  { %p296_p10 = pnand %p294_p9, %p291_p8 }
  0x18   :  { %299 = shalt.err (!%p296_p10)
}
  0x19   :  { %s300_s6 = scalar_lea.vmem %s368_s15, 2048  ;;  %p305_p12 = scmp.lt.s32.totalorder %s368_s15, %s368_s15 }
  0x1a   :  { %p301_p11 = scmp.ne.s32.totalorder %s368_s15, %s300_s6  ;;  %p306_p13 = scmp.lt.s32.totalorder %s300_s6, %s300_s6 }
  0x1c   :  { %p307_p0 = por %p306_p13, %p305_p12 }
  0x1e   :  { %p308_p1 = pnand %p307_p0, %p301_p11 }
  0x20   :  { %311 = shalt.err (!%p308_p1)
}
  0x21   :  { %s342_s0 = smov 128   ;;  %s343_s7 = smov 8  }
  0x22   :  { %32 = dma.hbm_to_vmem [thread:$0]  %s415_s1, 2048, %s368_s15, [#allocation7], %s342_s0, %s342_s0, %s343_s7  }
  0x23   :  { %334 = dma.done.wait [#allocation4], 128  }
  0x24   :  { %335 = vsyncadd [#allocation4], 4294967168 }
  0x25   :  { %336 = dma.done.wait [#allocation7], 2048  }
  0x26   :  { %337 = vsyncadd [#allocation7], 4294965248  ;;  %v344_v0 = vmov 0.0|0.0   ;;  %vm345_vm0 = vmmov 0   ;;  %v346_v1 = vmov 0.0   ;;  %v48_v2 = vld [vmem:[#allocation6] sm:$0xff] }
  0x27   :  { %232 = vmatprep.subr.bf16.mxu0 %v344_v0  ;;  %229 = vmatprep.mubr.msk.f32.mxu0 %vm345_vm0, %v346_v1  ;;  %v49_v3 = vld [vmem:[#allocation6 + $0x8] sm:$0xff]  ;;  %v50_v4 = vld [vmem:[#allocation6 + $0x10] sm:$0xff]  ;;  %v51_v6 = vld [vmem:[#allocation6 + $0x18] sm:$0xff]  ;;  %s347_s11 = smov [#allocation8]  }
  0x28   :  { %v233_v5 = vpack.c.bf16 %v49_v3, %v48_v2  ;;  %v236_v7 = vpack.c.bf16 %v51_v6, %v50_v4  ;;  %v52_v8 = vld [vmem:[#allocation6 + $0x20] sm:$0xff]  ;;  %v53_v9 = vld [vmem:[#allocation6 + $0x28] sm:$0xff]  ;;  %v54_v11 = vld [vmem:[#allocation6 + $0x30] sm:$0xff]  ;;  %s169_s12 = sshll.u32 %s347_s11, 4  ;;  %s170_s12 = int_to_ptr.vmem [resolvable:$true] %s169_s12 }
  0x29   :  { %v239_v10 = vpack.c.bf16 %v53_v9, %v52_v8  ;;  %v55_v12 = vld [vmem:[#allocation6 + $0x38] sm:$0xff]  ;;  %v56_v14 = vld [vmem:[#allocation6 + $0x40] sm:$0xff]  ;;  %v57_v15 = vld [vmem:[#allocation6 + $0x48] sm:$0xff]  ;;  %p317_p3 = scmp.lt.s32.totalorder %s170_s12, %s170_s12 }
  0x2a   :  { %234 = vmatpush3.bf16.msra.mxu0 %v233_v5  ;;  %v242_v13 = vpack.c.bf16 %v55_v12, %v54_v11  ;;  %v245_v16 = vpack.c.bf16 %v57_v15, %v56_v14  ;;  %v58_v17 = vld [vmem:[#allocation6 + $0x50] sm:$0xff]  ;;  %v59_v18 = vld [vmem:[#allocation6 + $0x58] sm:$0xff]  ;;  %v60_v20 = vld [vmem:[#allocation6 + $0x60] sm:$0xff] }
  0x2b   :  { %235 = vmatprep.subr.bf16.mxu0 %v344_v0  ;;  %v248_v19 = vpack.c.bf16 %v59_v18, %v58_v17  ;;  %v61_v21 = vld [vmem:[#allocation6 + $0x68] sm:$0xff]  ;;  %v62_v23 = vld [vmem:[#allocation6 + $0x70] sm:$0xff]  ;;  %v63_v24 = vld [vmem:[#allocation6 + $0x78] sm:$0xff] }
  0x2c   :  { %v251_v22 = vpack.c.bf16 %v61_v21, %v60_v20  ;;  %v254_v25 = vpack.c.bf16 %v63_v24, %v62_v23  ;;  %v47_v26 = vld [vmem:[#allocation3] sm:$0xff] }
  0x2d   :  { %v179_v27 = vld [vmem:[%s416_s2] ss:$0 sm:$0xff]  ;;  %s312_s2 = scalar_lea.vmem %s170_s12, 128 }
  0x2e   :  { %237 = vmatpush3.bf16.msra.mxu0 %v236_v7  ;;  %p313_p2 = scmp.ne.s32.totalorder %s170_s12, %s312_s2  ;;  %p318_p4 = scmp.lt.s32.totalorder %s312_s2, %s312_s2 }
  0x2f   :  { %238 = vmatprep.subr.bf16.mxu0 %v344_v0 }
  0x30   :  { %p319_p5 = por %p318_p4, %p317_p3 }
  0x32   :  { %240 = vmatpush3.bf16.msra.mxu0 %v239_v10  ;;  %p320_p6 = pnand %p319_p5, %p313_p2 }
  0x33   :  { %241 = vmatprep.subr.bf16.mxu0 %v344_v0 }
  0x36   :  { %243 = vmatpush3.bf16.msra.mxu0 %v242_v13 }
  0x37   :  { %244 = vmatprep.subr.bf16.mxu0 %v344_v0 }
  0x3a   :  { %246 = vmatpush3.bf16.msra.mxu0 %v245_v16 }
  0x3b   :  { %247 = vmatprep.subr.bf16.mxu0 %v344_v0 }
  0x3e   :  { %249 = vmatpush3.bf16.msra.mxu0 %v248_v19 }
  0x3f   :  { %250 = vmatprep.subr.bf16.mxu0 %v344_v0 }
  0x42   :  { %252 = vmatpush3.bf16.msra.mxu0 %v251_v22 }
  0x43   :  { %253 = vmatprep.subr.bf16.mxu0 %v344_v0 }
  0x46   :  { %255 = vmatpush3.bf16.msra.mxu0 %v254_v25 }
  0x49   :  { %230 = vmatmul.mubr.f32.vlgmr.msra.gmra.mrb[0].mxu0 %v47_v26 }
 0x11c   :  { %v130_v28 = vpop.f32.mrb[0].mxu0 }
 0x11d   :  { %v147_v29 = vadd.f32 %v179_v27, %v130_v28  ;;  %v231_v30 = vpop.f32.mrb[1].mxu0 }
 0x11f   :  { %v148_v31 = vmin.f32 %v147_v29, 20.0  ;;  %vm160_vm2 = vcmp.gt.f32.partialorder %v147_v29, 20.0 }
 0x121   :  { %v149_v32 = vmul.f32 1.442695, %v148_v31 }
 0x123   :  { %264 = vpow2.f32 %v149_v32 }
 0x12d   :  { %v265_v33 = vpop.eup %264 }
 0x12e   :  { %v151_v34 = vadd.f32 1.0, %v265_v33  ;;  %v154_v35 = vmul.f32 -0.5, %v265_v33  ;;  %v157_v37 = vand.u32 2147483647, %v265_v33 }
 0x130   :  { %266 = vlog2.f32 %v151_v34  ;;  %v155_v36 = vadd.f32 1.0, %v154_v35  ;;  %vm158_vm1 = vcmp.lt.f32.partialorder %v157_v37, 0.0004427343 }
 0x132   :  { %v156_v40 = vmul.f32 %v265_v33, %v155_v36 }
 0x13a   :  { %v267_v38 = vpop.eup %266 }
 0x13b   :  { %v153_v39 = vmul.f32 0.6931472, %v267_v38 }
 0x13d   :  { %v159_v41 = vsel %vm158_vm1, %v156_v40, %v153_v39 }
 0x13e   :  { %v161_v42 = vsel %vm160_vm2, %v147_v29, %v159_v41 }
 0x13f   :  { %162 = vst [vmem:[#allocation8] sm:$0xff] %v161_v42 }
 0x140   :  { %323 = shalt.err (!%p320_p6)
}
 0x141   :  { %s324_s15 = scalar_lea.hbm %s417_s3, 128 }
 0x142   :  { %p325_p7 = scmp.ne.s32.totalorder %s417_s3, %s324_s15  ;;  %p328_p8 = scmp.lt.u32.totalorder %s324_s15, %s417_s3 }
 0x144   :  { %p330_p9 = pnand %p328_p8, %p325_p7 }
 0x146   :  { %333 = shalt.err (!%p330_p9)
}
 0x147   :  { %172 = dma.vmem_to_hbm [thread:$0]  %s170_s12, 128, %s417_s3, [#allocation5]  }
 0x148   :  { %338 = dma.done.wait [#allocation5], 128  }
 0x149   :  { %339 = vsyncadd [#allocation5], 4294967168 }
 0x14a   :  { %176 = vsyncpa [#allocation4], 1 }
 0x14b   :  { %177 = vsyncpa [#allocation7], 1 }
 0x14c   :  { %178 = vsyncpa [#allocation5], 1 }

</bundles_post_ra>
